<compile_context>
chip_gen: v5e
topology: v5e:2x2
jax: 0.10.0
libtpu: 0.0.40
codegen_flags: <defaults>
</compile_context>

<pallas_src>
import functools

import jax
import jax.numpy as jnp
from jax.experimental import pallas as pl
from jax.experimental.pallas import tpu as pltpu

CONFIG = dict(
    num_layer=3,
    emb_dim=32,
    drop_ratio=0.0,          # F.dropout with p=0 is identity
    gnn_type='gcn',
    bn=True,
    residual_connect=True,
    num_atom_features=8,
    num_bond_features=4,
    act='relu',
)

BN_EPS = 1e-5
LANE_PAD = 128               # lane-dense hidden width (emb_dim=32 padded to 128)
ROW_TILE_MAX = 256           # rows of A streamed per DMA step
MATMUL_DTYPE = jnp.bfloat16  # MXU input dtype; set to jnp.float32 for exact f32


def _round_up(v, m):
    return (v + m - 1) // m * m


def _full_spec(shape):
    # whole array resident in VMEM (block == full array, single grid point)
    return pl.BlockSpec(shape, lambda: (0,) * len(shape))


# ----------------------------- fused Pallas kernel -----------------------------

def _fused_gnn_kernel(a_hbm, x_ref, wx_ref, wl_ref, vec_ref, o_ref,
                      h_ref, z_ref, a_buf, sem,
                      *, num_layer, n_real, row_tile, num_tiles):
    # a_hbm:  [Np, Np]  bf16 symmetric-normalized adjacency, stays in HBM (ANY)
    # x_ref:  [Np, F]   bf16 atom features (VMEM)
    # wx_ref: [F, 128]  bf16 linear_x weight
    # wl_ref: [L,128,128] bf16 stacked GCN layer weights
    # vec_ref:[1+3L,128] f32; row 0: b_x; rows 1+3l..3+3l: b, gamma, beta
    # h_ref/z_ref: [Np, 128] f32 resident hidden / pre-BN scratch
    # a_buf:  [S, row_tile, Np] bf16 streamed A row tiles, sem: DMA sems [S]
    n_pad = h_ref.shape[0]

    def start_fetch(t, slot):
        pltpu.make_async_copy(
            a_hbm.at[pl.ds(t * row_tile, row_tile), :],
            a_buf.at[slot], sem.at[slot]).start()

    def wait_fetch(slot):
        pltpu.make_async_copy(
            a_hbm.at[pl.ds(0, row_tile), :],      # shape-only src for the wait
            a_buf.at[slot], sem.at[slot]).wait()

    # Whole padded A fits in one tile: fetch it once (overlapped with the
    # linear_x matmul below) and reuse it for every layer.
    if num_tiles == 1:
        start_fetch(0, 0)

    # linear_x: h0 = x @ W_x + b_x   (f32 accumulation on the MXU)
    h_ref[...] = (jnp.dot(x_ref[...], wx_ref[...],
                          preferred_element_type=jnp.float32)
                  + vec_ref[0:1, :])

    if num_tiles == 1:
        wait_fetch(0)

    # Row-validity mask so BatchNorm stats ignore padded node rows.
    if n_real == n_pad:
        def masked(v):
            return v
    else:
        rid = jax.lax.broadcasted_iota(jnp.int32, (n_pad, 1), 0)
        vmask = (rid < n_real).astype(jnp.float32)

        def masked(v):
            return v * vmask
    inv_n = 1.0 / float(n_real)

    for l in range(num_layer):                      # static unroll, L is small
        w_mm = wl_ref[l]
        b = vec_ref[1 + 3 * l: 2 + 3 * l, :]
        gamma = vec_ref[2 + 3 * l: 3 + 3 * l, :]
        beta = vec_ref[3 + 3 * l: 4 + 3 * l, :]

        h_mm = h_ref[...].astype(MATMUL_DTYPE)      # reused by every row tile

        # GCNConv: z = A_hat @ (h W) + b == (A_hat @ h) @ W + b, + residual h
        if num_tiles == 1:
            agg = jnp.dot(a_buf[0], h_mm, preferred_element_type=jnp.float32)
            z_ref[...] = (jnp.dot(agg.astype(MATMUL_DTYPE), w_mm,
                                  preferred_element_type=jnp.float32)
                          + b + h_ref[...])
        else:
            start_fetch(0, 0)                       # prime tile 0 of this layer

            @pl.loop(0, num_tiles)
            def _(t):
                slot = t & 1
                wait_fetch(slot)

                @pl.when(t + 1 < num_tiles)
                def _():
                    start_fetch(t + 1, 1 - slot)    # prefetch next row tile

                agg = jnp.dot(a_buf[slot], h_mm,
                              preferred_element_type=jnp.float32)
                row0 = pl.multiple_of(t * row_tile, row_tile)
                z_ref[pl.ds(row0, row_tile), :] = (
                    jnp.dot(agg.astype(MATMUL_DTYPE), w_mm,
                            preferred_element_type=jnp.float32)
                    + b + h_ref[pl.ds(row0, row_tile), :])

        # BatchNorm1d over the node axis, training-mode (biased) batch stats,
        # two-pass variance, masked to the real rows, gamma folded into scale.
        z = z_ref[...]
        mean = jnp.sum(masked(z), axis=0, keepdims=True) * inv_n
        centered = z - mean
        var = jnp.sum(masked(centered * centered), axis=0, keepdims=True) * inv_n
        hn = centered * (gamma * jax.lax.rsqrt(var + BN_EPS)) + beta

        if l != num_layer - 1:                      # last layer: no activation
            hn = jnp.maximum(hn, 0.0)
        # dropout(drop_ratio=0.0) == identity
        h_ref[...] = hn

    o_ref[...] = h_ref[...]


# ------------------------------ JAX glue / wrappers ------------------------------

def dense_norm_adj(edge_index, num_nodes):
    """A_hat = D^-1/2 (A + I_missing) D^-1/2 from edge_index [2, E].

    Duplicate edges are counted (like PyG gcn_norm); self-loops are only added
    to nodes that do not already have one.  Plain XLA work; precompute/hoist
    when edge_index is static across forward calls.
    """
    src, dst = edge_index[0], edge_index[1]
    a = jnp.zeros((num_nodes, num_nodes), jnp.float32).at[dst, src].add(1.0)
    diag = jnp.diagonal(a)
    a = a + jnp.diag(jnp.where(diag > 0, 0.0, 1.0))
    deg = a.sum(axis=1)
    dinv = jnp.where(deg > 0, jax.lax.rsqrt(deg), 0.0)
    return a * dinv[:, None] * dinv[None, :]


def init_params(key, cfg):
    """Compact (un-padded) parameters matching the PyTorch module's shapes."""
    d = cfg['emb_dim']
    f = cfg['num_atom_features']
    keys = jax.random.split(key, 2 + 2 * cfg['num_layer'])
    params = {
        'w_x': jax.random.normal(keys[0], (f, d), jnp.float32) / jnp.sqrt(f),
        'b_x': jax.random.normal(keys[1], (1, d), jnp.float32) * 0.01,
        'layers': [],
    }
    for l in range(cfg['num_layer']):
        params['layers'].append(dict(
            w=jax.random.normal(keys[2 + 2 * l], (d, d), jnp.float32) / jnp.sqrt(d),
            b=jax.random.normal(keys[3 + 2 * l], (1, d), jnp.float32) * 0.01,
            gamma=jnp.ones((1, d), jnp.float32),   # BatchNorm1d default init
            beta=jnp.zeros((1, d), jnp.float32),
        ))
    return params


def pack_params(params, cfg):
    """Zero-pad to lane-dense width, stack all layers, pre-cast matmul weights."""
    d = cfg['emb_dim']
    f = cfg['num_atom_features']
    L = cfg['num_layer']
    wx = jnp.zeros((f, LANE_PAD), jnp.float32).at[:, :d].set(params['w_x'])
    wl = jnp.zeros((L, LANE_PAD, LANE_PAD), jnp.float32)
    vec = jnp.zeros((1 + 3 * L, LANE_PAD), jnp.float32)
    vec = vec.at[0, :d].set(params['b_x'][0])
    for l, p in enumerate(params['layers']):
        wl = wl.at[l, :d, :d].set(p['w'])
        vec = vec.at[1 + 3 * l, :d].set(p['b'][0])
        vec = vec.at[2 + 3 * l, :d].set(p['gamma'][0])
        vec = vec.at[3 + 3 * l, :d].set(p['beta'][0])
    return dict(wx=wx.astype(MATMUL_DTYPE), wl=wl.astype(MATMUL_DTYPE), vec=vec)


def _choose_tiling(n):
    """(n_pad, row_tile, num_tiles): bf16 sublane-friendly row padding/tiling."""
    n16 = _round_up(max(n, 1), 16)
    if n16 <= ROW_TILE_MAX:
        return n16, n16, 1
    n_pad = _round_up(n, ROW_TILE_MAX)
    return n_pad, ROW_TILE_MAX, n_pad // ROW_TILE_MAX


def _vmem_limit_bytes(n_pad, row_tile, num_slots, f, num_layer):
    """Per-generation VMEM budget: actual footprint + margin, capped to chip."""
    est = (3 * n_pad * LANE_PAD * 4                          # h, z, out (f32)
           + num_slots * row_tile * n_pad * 2                # streamed A tiles
           + n_pad * f * 2                                   # x (bf16)
           + (f * LANE_PAD + num_layer * LANE_PAD * LANE_PAD) * 2   # weights
           + (1 + 3 * num_layer) * LANE_PAD * 4)             # packed vectors
    try:
        cap = int(pltpu.get_tpu_info().vmem_capacity_bytes)
    except Exception:
        cap = 64 * 1024 * 1024                               # v7x per-TC floor
    want = max(int(1.5 * est) + (4 << 20), 32 << 20)
    return int(min(want, int(cap * 0.8)))


def gnn_forward(packed, x, edge_index, edge_attr, cfg=CONFIG):
    # edge_attr unused for gnn_type='gcn' (only gine/pna/nn conv use linear_b)
    del edge_attr
    n, f = x.shape
    d = cfg['emb_dim']
    L = cfg['num_layer']

    n_pad, row_tile, num_tiles = _choose_tiling(n)
    num_slots = 2 if num_tiles > 1 else 1

    # bf16 adjacency built (and padded) in the wrapper; stays in HBM.
    a_hat = dense_norm_adj(edge_index, n).astype(MATMUL_DTYPE)
    a_p = jnp.zeros((n_pad, n_pad), MATMUL_DTYPE).at[:n, :n].set(a_hat)
    x_p = jnp.zeros((n_pad, f), MATMUL_DTYPE).at[:n, :].set(x.astype(MATMUL_DTYPE))

    kernel = functools.partial(
        _fused_gnn_kernel, num_layer=L, n_real=n,
        row_tile=row_tile, num_tiles=num_tiles)

    out_p = pl.pallas_call(
        kernel,
        out_shape=jax.ShapeDtypeStruct((n_pad, LANE_PAD), jnp.float32),
        in_specs=[pl.BlockSpec(memory_space=pl.ANY),   # A_hat: raw HBM ref
                  _full_spec(x_p.shape),
                  _full_spec(packed['wx'].shape),
                  _full_spec(packed['wl'].shape),
                  _full_spec(packed['vec'].shape)],
        out_specs=_full_spec((n_pad, LANE_PAD)),
        scratch_shapes=[
            pltpu.VMEM((n_pad, LANE_PAD), jnp.float32),          # h (resident)
            pltpu.VMEM((n_pad, LANE_PAD), jnp.float32),          # z (pre-BN)
            pltpu.VMEM((num_slots, row_tile, n_pad), MATMUL_DTYPE),  # A tiles
            pltpu.SemaphoreType.DMA((num_slots,)),
        ],
        compiler_params=pltpu.CompilerParams(
            vmem_limit_bytes=_vmem_limit_bytes(n_pad, row_tile, num_slots, f, L)),
    )(a_p, x_p, packed['wx'], packed['wl'], packed['vec'])

    return out_p[:n, :d]   # node_representation = h_list[-1]


# TODO(synk): gnn_type='dmpnn' branch (directed message passing over bond
# incidence tables a2b/b2a/b2revb) and the gineconv/pnaconv/nnconv edge-feature
# path (linear_b) are not implemented; only the 'gcn' path is.

if __name__ == "__main__":
    key = jax.random.PRNGKey(0)
    k_x, k_e, k_a, k_p, k_x2, k_e2 = jax.random.split(key, 6)

    params = init_params(k_p, CONFIG)
    packed = pack_params(params, CONFIG)

    # --- small single-tile graph (A fetched once, reused across layers) ---
    N, E = 16, 48
    x = jax.random.normal(k_x, (N, CONFIG['num_atom_features']), jnp.float32)
    edge_index = jax.random.randint(k_e, (2, E), 0, N, dtype=jnp.int32)
    edge_attr = jax.random.normal(k_a, (E, CONFIG['num_bond_features']), jnp.float32)

    out = gnn_forward(packed, x, edge_index, edge_attr)
    out = jax.block_until_ready(out)
    assert out.shape == (N, CONFIG['emb_dim']), out.shape
    assert out.dtype == jnp.float32
    assert bool(jnp.all(jnp.isfinite(out)))

    # --- larger graph exercising the streamed / double-buffered A path ---
    N2, E2 = 600, 2400                      # n_pad=768, 3 row tiles of 256
    x2 = jax.random.normal(k_x2, (N2, CONFIG['num_atom_features']), jnp.float32)
    edge_index2 = jax.random.randint(k_e2, (2, E2), 0, N2, dtype=jnp.int32)

    out2 = gnn_forward(packed, x2, edge_index2, None)
    out2 = jax.block_until_ready(out2)
    assert out2.shape == (N2, CONFIG['emb_dim']), out2.shape
    assert bool(jnp.all(jnp.isfinite(out2)))

    print("KERNEL_OK")
</pallas_src>

<mosaic_0001>
module attributes {stable_mosaic.version = 11 : i64} {
  func.func @_fused_gnn_kernel(%arg0: memref<16x16xbf16, #tpu.memory_space<any>>, %arg1: memref<16x8xbf16, #tpu.memory_space<vmem>>, %arg2: memref<8x128xbf16, #tpu.memory_space<vmem>>, %arg3: memref<3x128x128xbf16, #tpu.memory_space<vmem>>, %arg4: memref<10x128xf32, #tpu.memory_space<vmem>>, %arg5: memref<16x128xf32, #tpu.memory_space<vmem>>, %arg6: memref<16x128xf32, #tpu.memory_space<vmem>>, %arg7: memref<16x128xf32, #tpu.memory_space<vmem>>, %arg8: memref<1x16x16xbf16, #tpu.memory_space<vmem>>, %arg9: memref<1x!tpu.dma_semaphore, #tpu.memory_space<semaphore_mem>>) attributes {dimension_semantics = [], scalar_prefetch = 0 : i64, scratch_operands = 4 : i64, tpu.core_type = #tpu.core_type<tc>} {
    %c0_i32 = arith.constant 0 : i32
    %c0_i32_0 = arith.constant 0 : i32
    %c0_i32_1 = arith.constant 0 : i32
    %c0_i32_2 = arith.constant 0 : i32
    %0 = tpu.memref_slice %arg0[%c0_i32_1, %c0_i32_2] : memref<16x16xbf16, #tpu.memory_space<any>> -> memref<16x16xbf16, #tpu.memory_space<any>>
    %c0_i32_3 = arith.constant 0 : i32
    %c0_i32_4 = arith.constant 0 : i32
    %1 = tpu.memref_slice %arg8[%c0_i32, %c0_i32_3, %c0_i32_4] : memref<1x16x16xbf16, #tpu.memory_space<vmem>> -> memref<1x16x16xbf16, #tpu.memory_space<vmem>>
    %2 = tpu.memref_squeeze %1 : memref<1x16x16xbf16, #tpu.memory_space<vmem>> -> memref<16x16xbf16, #tpu.memory_space<vmem>>
    %3 = tpu.memref_slice %arg9[%c0_i32_0] : memref<1x!tpu.dma_semaphore, #tpu.memory_space<semaphore_mem>> -> memref<1x!tpu.dma_semaphore, #tpu.memory_space<semaphore_mem>>
    %4 = tpu.memref_squeeze %3 : memref<1x!tpu.dma_semaphore, #tpu.memory_space<semaphore_mem>> -> memref<!tpu.dma_semaphore, #tpu.memory_space<semaphore_mem>>
    tpu.enqueue_dma source(%0 : memref<16x16xbf16, #tpu.memory_space<any>>) target(%2 : memref<16x16xbf16, #tpu.memory_space<vmem>>) target_semaphore(%4 : memref<!tpu.dma_semaphore, #tpu.memory_space<semaphore_mem>>)
    %c0 = arith.constant 0 : index
    %c0_5 = arith.constant 0 : index
    %5 = vector.load %arg1[%c0, %c0_5] : memref<16x8xbf16, #tpu.memory_space<vmem>>, vector<16x8xbf16>
    %c0_6 = arith.constant 0 : index
    %c0_7 = arith.constant 0 : index
    %6 = vector.load %arg2[%c0_6, %c0_7] : memref<8x128xbf16, #tpu.memory_space<vmem>>, vector<8x128xbf16>
    %cst = arith.constant dense<0.000000e+00> : vector<16x128xf32>
    %7 = tpu.matmul %5, %6, %cst {dimension_numbers = #tpu.dot_dimension_numbers<[1], [0], [0], [1], [0, 0, 1, 1], [], []>} : vector<16x8xbf16>, vector<8x128xbf16>, vector<16x128xf32> -> vector<16x128xf32>
    %c0_8 = arith.constant 0 : index
    %c0_9 = arith.constant 0 : index
    %8 = vector.load %arg4[%c0_8, %c0_9] : memref<10x128xf32, #tpu.memory_space<vmem>>, vector<1x128xf32>
    %9 = vector.broadcast %8 : vector<1x128xf32> to vector<16x128xf32>
    %10 = arith.addf %7, %9 : vector<16x128xf32>
    %c0_10 = arith.constant 0 : index
    %c0_11 = arith.constant 0 : index
    %11 = vector.load %arg6[%c0_10, %c0_11] : memref<16x128xf32, #tpu.memory_space<vmem>>, vector<16x128xf32>
    tpu.vector_store %arg6[%c0_10, %c0_11], %10 {strides = array<i32>} : memref<16x128xf32, #tpu.memory_space<vmem>>, vector<16x128xf32>,
    %c0_i32_12 = arith.constant 0 : i32
    %c0_i32_13 = arith.constant 0 : i32
    %c0_i32_14 = arith.constant 0 : i32
    %c0_i32_15 = arith.constant 0 : i32
    %12 = tpu.memref_slice %arg0[%c0_i32_14, %c0_i32_15] : memref<16x16xbf16, #tpu.memory_space<any>> -> memref<16x16xbf16, #tpu.memory_space<any>>
    %c0_i32_16 = arith.constant 0 : i32
    %c0_i32_17 = arith.constant 0 : i32
    %13 = tpu.memref_slice %arg8[%c0_i32_12, %c0_i32_16, %c0_i32_17] : memref<1x16x16xbf16, #tpu.memory_space<vmem>> -> memref<1x16x16xbf16, #tpu.memory_space<vmem>>
    %14 = tpu.memref_squeeze %13 : memref<1x16x16xbf16, #tpu.memory_space<vmem>> -> memref<16x16xbf16, #tpu.memory_space<vmem>>
    %15 = tpu.memref_slice %arg9[%c0_i32_13] : memref<1x!tpu.dma_semaphore, #tpu.memory_space<semaphore_mem>> -> memref<1x!tpu.dma_semaphore, #tpu.memory_space<semaphore_mem>>
    %16 = tpu.memref_squeeze %15 : memref<1x!tpu.dma_semaphore, #tpu.memory_space<semaphore_mem>> -> memref<!tpu.dma_semaphore, #tpu.memory_space<semaphore_mem>>
    tpu.wait_dma2 semaphore(%16 : memref<!tpu.dma_semaphore, #tpu.memory_space<semaphore_mem>>) src(%12 : memref<16x16xbf16, #tpu.memory_space<any>>) dst(%14 : memref<16x16xbf16, #tpu.memory_space<vmem>>)
    %c0_18 = arith.constant 0 : index
    %c0_19 = arith.constant 0 : index
    %c0_20 = arith.constant 0 : index
    %17 = vector.load %arg3[%c0_18, %c0_19, %c0_20] : memref<3x128x128xbf16, #tpu.memory_space<vmem>>, vector<1x128x128xbf16>
    %18 = vector.shape_cast %17 : vector<1x128x128xbf16> to vector<128x128xbf16>
    %c1 = arith.constant 1 : index
    %c0_21 = arith.constant 0 : index
    %19 = vector.load %arg4[%c1, %c0_21] : memref<10x128xf32, #tpu.memory_space<vmem>>, vector<1x128xf32>
    %c2 = arith.constant 2 : index
    %c0_22 = arith.constant 0 : index
    %20 = vector.load %arg4[%c2, %c0_22] : memref<10x128xf32, #tpu.memory_space<vmem>>, vector<1x128xf32>
    %c3 = arith.constant 3 : index
    %c0_23 = arith.constant 0 : index
    %21 = vector.load %arg4[%c3, %c0_23] : memref<10x128xf32, #tpu.memory_space<vmem>>, vector<1x128xf32>
    %c0_24 = arith.constant 0 : index
    %c0_25 = arith.constant 0 : index
    %22 = vector.load %arg6[%c0_24, %c0_25] : memref<16x128xf32, #tpu.memory_space<vmem>>, vector<16x128xf32>
    %23 = arith.truncf %22 : vector<16x128xf32> to vector<16x128xbf16>
    %c0_26 = arith.constant 0 : index
    %c0_27 = arith.constant 0 : index
    %c0_28 = arith.constant 0 : index
    %24 = vector.load %arg8[%c0_26, %c0_27, %c0_28] : memref<1x16x16xbf16, #tpu.memory_space<vmem>>, vector<1x16x16xbf16>
    %25 = vector.shape_cast %24 : vector<1x16x16xbf16> to vector<16x16xbf16>
    %cst_29 = arith.constant dense<0.000000e+00> : vector<16x128xf32>
    %26 = tpu.matmul %25, %23, %cst_29 {dimension_numbers = #tpu.dot_dimension_numbers<[1], [0], [0], [1], [0, 0, 1, 1], [], []>} : vector<16x16xbf16>, vector<16x128xbf16>, vector<16x128xf32> -> vector<16x128xf32>
    %27 = arith.truncf %26 : vector<16x128xf32> to vector<16x128xbf16>
    %cst_30 = arith.constant dense<0.000000e+00> : vector<16x128xf32>
    %28 = tpu.matmul %27, %18, %cst_30 {dimension_numbers = #tpu.dot_dimension_numbers<[1], [0], [0], [1], [0, 0, 1, 1], [], []>} : vector<16x128xbf16>, vector<128x128xbf16>, vector<16x128xf32> -> vector<16x128xf32>
    %29 = vector.broadcast %19 : vector<1x128xf32> to vector<16x128xf32>
    %30 = arith.addf %28, %29 : vector<16x128xf32>
    %c0_31 = arith.constant 0 : index
    %c0_32 = arith.constant 0 : index
    %31 = vector.load %arg6[%c0_31, %c0_32] : memref<16x128xf32, #tpu.memory_space<vmem>>, vector<16x128xf32>
    %32 = arith.addf %30, %31 : vector<16x128xf32>
    %c0_33 = arith.constant 0 : index
    %c0_34 = arith.constant 0 : index
    %33 = vector.load %arg7[%c0_33, %c0_34] : memref<16x128xf32, #tpu.memory_space<vmem>>, vector<16x128xf32>
    tpu.vector_store %arg7[%c0_33, %c0_34], %32 {strides = array<i32>} : memref<16x128xf32, #tpu.memory_space<vmem>>, vector<16x128xf32>,
    %c0_35 = arith.constant 0 : index
    %c0_36 = arith.constant 0 : index
    %34 = vector.load %arg7[%c0_35, %c0_36] : memref<16x128xf32, #tpu.memory_space<vmem>>, vector<16x128xf32>
    %cst_37 = arith.constant dense<0.000000e+00> : vector<128xf32>
    %35 = vector.multi_reduction <add>, %34, %cst_37 [0] : vector<16x128xf32> to vector<128xf32>
    %36 = vector.shape_cast %35 : vector<128xf32> to vector<1x128xf32>
    %cst_38 = arith.constant 6.250000e-02 : f32
    %37 = vector.broadcast %cst_38 : f32 to vector<1x128xf32>
    %38 = arith.mulf %36, %37 : vector<1x128xf32>
    %39 = vector.broadcast %38 : vector<1x128xf32> to vector<16x128xf32>
    %40 = arith.subf %34, %39 : vector<16x128xf32>
    %41 = arith.mulf %40, %40 : vector<16x128xf32>
    %cst_39 = arith.constant dense<0.000000e+00> : vector<128xf32>
    %42 = vector.multi_reduction <add>, %41, %cst_39 [0] : vector<16x128xf32> to vector<128xf32>
    %43 = vector.shape_cast %42 : vector<128xf32> to vector<1x128xf32>
    %cst_40 = arith.constant 6.250000e-02 : f32
    %44 = vector.broadcast %cst_40 : f32 to vector<1x128xf32>
    %45 = arith.mulf %43, %44 : vector<1x128xf32>
    %cst_41 = arith.constant 9.99999974E-6 : f32
    %46 = vector.broadcast %cst_41 : f32 to vector<1x128xf32>
    %47 = arith.addf %45, %46 : vector<1x128xf32>
    %48 = math.rsqrt %47 : vector<1x128xf32>
    %49 = arith.mulf %20, %48 : vector<1x128xf32>
    %50 = vector.broadcast %49 : vector<1x128xf32> to vector<16x128xf32>
    %51 = arith.mulf %40, %50 : vector<16x128xf32>
    %52 = vector.broadcast %21 : vector<1x128xf32> to vector<16x128xf32>
    %53 = arith.addf %51, %52 : vector<16x128xf32>
    %cst_42 = arith.constant 0.000000e+00 : f32
    %54 = vector.broadcast %cst_42 : f32 to vector<16x128xf32>
    %55 = arith.maximumf %53, %54 : vector<16x128xf32>
    %c0_43 = arith.constant 0 : index
    %c0_44 = arith.constant 0 : index
    %56 = vector.load %arg6[%c0_43, %c0_44] : memref<16x128xf32, #tpu.memory_space<vmem>>, vector<16x128xf32>
    tpu.vector_store %arg6[%c0_43, %c0_44], %55 {strides = array<i32>} : memref<16x128xf32, #tpu.memory_space<vmem>>, vector<16x128xf32>,
    %c1_45 = arith.constant 1 : index
    %c0_46 = arith.constant 0 : index
    %c0_47 = arith.constant 0 : index
    %57 = vector.load %arg3[%c1_45, %c0_46, %c0_47] : memref<3x128x128xbf16, #tpu.memory_space<vmem>>, vector<1x128x128xbf16>
    %58 = vector.shape_cast %57 : vector<1x128x128xbf16> to vector<128x128xbf16>
    %c4 = arith.constant 4 : index
    %c0_48 = arith.constant 0 : index
    %59 = vector.load %arg4[%c4, %c0_48] : memref<10x128xf32, #tpu.memory_space<vmem>>, vector<1x128xf32>
    %c5 = arith.constant 5 : index
    %c0_49 = arith.constant 0 : index
    %60 = vector.load %arg4[%c5, %c0_49] : memref<10x128xf32, #tpu.memory_space<vmem>>, vector<1x128xf32>
    %c6 = arith.constant 6 : index
    %c0_50 = arith.constant 0 : index
    %61 = vector.load %arg4[%c6, %c0_50] : memref<10x128xf32, #tpu.memory_space<vmem>>, vector<1x128xf32>
    %c0_51 = arith.constant 0 : index
    %c0_52 = arith.constant 0 : index
    %62 = vector.load %arg6[%c0_51, %c0_52] : memref<16x128xf32, #tpu.memory_space<vmem>>, vector<16x128xf32>
    %63 = arith.truncf %62 : vector<16x128xf32> to vector<16x128xbf16>
    %c0_53 = arith.constant 0 : index
    %c0_54 = arith.constant 0 : index
    %c0_55 = arith.constant 0 : index
    %64 = vector.load %arg8[%c0_53, %c0_54, %c0_55] : memref<1x16x16xbf16, #tpu.memory_space<vmem>>, vector<1x16x16xbf16>
    %65 = vector.shape_cast %64 : vector<1x16x16xbf16> to vector<16x16xbf16>
    %cst_56 = arith.constant dense<0.000000e+00> : vector<16x128xf32>
    %66 = tpu.matmul %65, %63, %cst_56 {dimension_numbers = #tpu.dot_dimension_numbers<[1], [0], [0], [1], [0, 0, 1, 1], [], []>} : vector<16x16xbf16>, vector<16x128xbf16>, vector<16x128xf32> -> vector<16x128xf32>
    %67 = arith.truncf %66 : vector<16x128xf32> to vector<16x128xbf16>
    %cst_57 = arith.constant dense<0.000000e+00> : vector<16x128xf32>
    %68 = tpu.matmul %67, %58, %cst_57 {dimension_numbers = #tpu.dot_dimension_numbers<[1], [0], [0], [1], [0, 0, 1, 1], [], []>} : vector<16x128xbf16>, vector<128x128xbf16>, vector<16x128xf32> -> vector<16x128xf32>
    %69 = vector.broadcast %59 : vector<1x128xf32> to vector<16x128xf32>
    %70 = arith.addf %68, %69 : vector<16x128xf32>
    %c0_58 = arith.constant 0 : index
    %c0_59 = arith.constant 0 : index
    %71 = vector.load %arg6[%c0_58, %c0_59] : memref<16x128xf32, #tpu.memory_space<vmem>>, vector<16x128xf32>
    %72 = arith.addf %70, %71 : vector<16x128xf32>
    %c0_60 = arith.constant 0 : index
    %c0_61 = arith.constant 0 : index
    %73 = vector.load %arg7[%c0_60, %c0_61] : memref<16x128xf32, #tpu.memory_space<vmem>>, vector<16x128xf32>
    tpu.vector_store %arg7[%c0_60, %c0_61], %72 {strides = array<i32>} : memref<16x128xf32, #tpu.memory_space<vmem>>, vector<16x128xf32>,
    %c0_62 = arith.constant 0 : index
    %c0_63 = arith.constant 0 : index
    %74 = vector.load %arg7[%c0_62, %c0_63] : memref<16x128xf32, #tpu.memory_space<vmem>>, vector<16x128xf32>
    %cst_64 = arith.constant dense<0.000000e+00> : vector<128xf32>
    %75 = vector.multi_reduction <add>, %74, %cst_64 [0] : vector<16x128xf32> to vector<128xf32>
    %76 = vector.shape_cast %75 : vector<128xf32> to vector<1x128xf32>
    %cst_65 = arith.constant 6.250000e-02 : f32
    %77 = vector.broadcast %cst_65 : f32 to vector<1x128xf32>
    %78 = arith.mulf %76, %77 : vector<1x128xf32>
    %79 = vector.broadcast %78 : vector<1x128xf32> to vector<16x128xf32>
    %80 = arith.subf %74, %79 : vector<16x128xf32>
    %81 = arith.mulf %80, %80 : vector<16x128xf32>
    %cst_66 = arith.constant dense<0.000000e+00> : vector<128xf32>
    %82 = vector.multi_reduction <add>, %81, %cst_66 [0] : vector<16x128xf32> to vector<128xf32>
    %83 = vector.shape_cast %82 : vector<128xf32> to vector<1x128xf32>
    %cst_67 = arith.constant 6.250000e-02 : f32
    %84 = vector.broadcast %cst_67 : f32 to vector<1x128xf32>
    %85 = arith.mulf %83, %84 : vector<1x128xf32>
    %cst_68 = arith.constant 9.99999974E-6 : f32
    %86 = vector.broadcast %cst_68 : f32 to vector<1x128xf32>
    %87 = arith.addf %85, %86 : vector<1x128xf32>
    %88 = math.rsqrt %87 : vector<1x128xf32>
    %89 = arith.mulf %60, %88 : vector<1x128xf32>
    %90 = vector.broadcast %89 : vector<1x128xf32> to vector<16x128xf32>
    %91 = arith.mulf %80, %90 : vector<16x128xf32>
    %92 = vector.broadcast %61 : vector<1x128xf32> to vector<16x128xf32>
    %93 = arith.addf %91, %92 : vector<16x128xf32>
    %cst_69 = arith.constant 0.000000e+00 : f32
    %94 = vector.broadcast %cst_69 : f32 to vector<16x128xf32>
    %95 = arith.maximumf %93, %94 : vector<16x128xf32>
    %c0_70 = arith.constant 0 : index
    %c0_71 = arith.constant 0 : index
    %96 = vector.load %arg6[%c0_70, %c0_71] : memref<16x128xf32, #tpu.memory_space<vmem>>, vector<16x128xf32>
    tpu.vector_store %arg6[%c0_70, %c0_71], %95 {strides = array<i32>} : memref<16x128xf32, #tpu.memory_space<vmem>>, vector<16x128xf32>,
    %c2_72 = arith.constant 2 : index
    %c0_73 = arith.constant 0 : index
    %c0_74 = arith.constant 0 : index
    %97 = vector.load %arg3[%c2_72, %c0_73, %c0_74] : memref<3x128x128xbf16, #tpu.memory_space<vmem>>, vector<1x128x128xbf16>
    %98 = vector.shape_cast %97 : vector<1x128x128xbf16> to vector<128x128xbf16>
    %c7 = arith.constant 7 : index
    %c0_75 = arith.constant 0 : index
    %99 = vector.load %arg4[%c7, %c0_75] : memref<10x128xf32, #tpu.memory_space<vmem>>, vector<1x128xf32>
    %c8 = arith.constant 8 : index
    %c0_76 = arith.constant 0 : index
    %100 = vector.load %arg4[%c8, %c0_76] : memref<10x128xf32, #tpu.memory_space<vmem>>, vector<1x128xf32>
    %c9 = arith.constant 9 : index
    %c0_77 = arith.constant 0 : index
    %101 = vector.load %arg4[%c9, %c0_77] : memref<10x128xf32, #tpu.memory_space<vmem>>, vector<1x128xf32>
    %c0_78 = arith.constant 0 : index
    %c0_79 = arith.constant 0 : index
    %102 = vector.load %arg6[%c0_78, %c0_79] : memref<16x128xf32, #tpu.memory_space<vmem>>, vector<16x128xf32>
    %103 = arith.truncf %102 : vector<16x128xf32> to vector<16x128xbf16>
    %c0_80 = arith.constant 0 : index
    %c0_81 = arith.constant 0 : index
    %c0_82 = arith.constant 0 : index
    %104 = vector.load %arg8[%c0_80, %c0_81, %c0_82] : memref<1x16x16xbf16, #tpu.memory_space<vmem>>, vector<1x16x16xbf16>
    %105 = vector.shape_cast %104 : vector<1x16x16xbf16> to vector<16x16xbf16>
    %cst_83 = arith.constant dense<0.000000e+00> : vector<16x128xf32>
    %106 = tpu.matmul %105, %103, %cst_83 {dimension_numbers = #tpu.dot_dimension_numbers<[1], [0], [0], [1], [0, 0, 1, 1], [], []>} : vector<16x16xbf16>, vector<16x128xbf16>, vector<16x128xf32> -> vector<16x128xf32>
    %107 = arith.truncf %106 : vector<16x128xf32> to vector<16x128xbf16>
    %cst_84 = arith.constant dense<0.000000e+00> : vector<16x128xf32>
    %108 = tpu.matmul %107, %98, %cst_84 {dimension_numbers = #tpu.dot_dimension_numbers<[1], [0], [0], [1], [0, 0, 1, 1], [], []>} : vector<16x128xbf16>, vector<128x128xbf16>, vector<16x128xf32> -> vector<16x128xf32>
    %109 = vector.broadcast %99 : vector<1x128xf32> to vector<16x128xf32>
    %110 = arith.addf %108, %109 : vector<16x128xf32>
    %c0_85 = arith.constant 0 : index
    %c0_86 = arith.constant 0 : index
    %111 = vector.load %arg6[%c0_85, %c0_86] : memref<16x128xf32, #tpu.memory_space<vmem>>, vector<16x128xf32>
    %112 = arith.addf %110, %111 : vector<16x128xf32>
    %c0_87 = arith.constant 0 : index
    %c0_88 = arith.constant 0 : index
    %113 = vector.load %arg7[%c0_87, %c0_88] : memref<16x128xf32, #tpu.memory_space<vmem>>, vector<16x128xf32>
    tpu.vector_store %arg7[%c0_87, %c0_88], %112 {strides = array<i32>} : memref<16x128xf32, #tpu.memory_space<vmem>>, vector<16x128xf32>,
    %c0_89 = arith.constant 0 : index
    %c0_90 = arith.constant 0 : index
    %114 = vector.load %arg7[%c0_89, %c0_90] : memref<16x128xf32, #tpu.memory_space<vmem>>, vector<16x128xf32>
    %cst_91 = arith.constant dense<0.000000e+00> : vector<128xf32>
    %115 = vector.multi_reduction <add>, %114, %cst_91 [0] : vector<16x128xf32> to vector<128xf32>
    %116 = vector.shape_cast %115 : vector<128xf32> to vector<1x128xf32>
    %cst_92 = arith.constant 6.250000e-02 : f32
    %117 = vector.broadcast %cst_92 : f32 to vector<1x128xf32>
    %118 = arith.mulf %116, %117 : vector<1x128xf32>
    %119 = vector.broadcast %118 : vector<1x128xf32> to vector<16x128xf32>
    %120 = arith.subf %114, %119 : vector<16x128xf32>
    %121 = arith.mulf %120, %120 : vector<16x128xf32>
    %cst_93 = arith.constant dense<0.000000e+00> : vector<128xf32>
    %122 = vector.multi_reduction <add>, %121, %cst_93 [0] : vector<16x128xf32> to vector<128xf32>
    %123 = vector.shape_cast %122 : vector<128xf32> to vector<1x128xf32>
    %cst_94 = arith.constant 6.250000e-02 : f32
    %124 = vector.broadcast %cst_94 : f32 to vector<1x128xf32>
    %125 = arith.mulf %123, %124 : vector<1x128xf32>
    %cst_95 = arith.constant 9.99999974E-6 : f32
    %126 = vector.broadcast %cst_95 : f32 to vector<1x128xf32>
    %127 = arith.addf %125, %126 : vector<1x128xf32>
    %128 = math.rsqrt %127 : vector<1x128xf32>
    %129 = arith.mulf %100, %128 : vector<1x128xf32>
    %130 = vector.broadcast %129 : vector<1x128xf32> to vector<16x128xf32>
    %131 = arith.mulf %120, %130 : vector<16x128xf32>
    %132 = vector.broadcast %101 : vector<1x128xf32> to vector<16x128xf32>
    %133 = arith.addf %131, %132 : vector<16x128xf32>
    %c0_96 = arith.constant 0 : index
    %c0_97 = arith.constant 0 : index
    %134 = vector.load %arg6[%c0_96, %c0_97] : memref<16x128xf32, #tpu.memory_space<vmem>>, vector<16x128xf32>
    tpu.vector_store %arg6[%c0_96, %c0_97], %133 {strides = array<i32>} : memref<16x128xf32, #tpu.memory_space<vmem>>, vector<16x128xf32>,
    %c0_98 = arith.constant 0 : index
    %c0_99 = arith.constant 0 : index
    %135 = vector.load %arg6[%c0_98, %c0_99] : memref<16x128xf32, #tpu.memory_space<vmem>>, vector<16x128xf32>
    %c0_100 = arith.constant 0 : index
    %c0_101 = arith.constant 0 : index
    %136 = vector.load %arg5[%c0_100, %c0_101] : memref<16x128xf32, #tpu.memory_space<vmem>>, vector<16x128xf32>
    tpu.vector_store %arg5[%c0_100, %c0_101], %135 {strides = array<i32>} : memref<16x128xf32, #tpu.memory_space<vmem>>, vector<16x128xf32>,
    return
  }
}

</mosaic_0001>

<bundles_post_ra>
// kernel: tpu_custom_call.1
= control target key start
LH: loop header
LB: loop body
LE: loop exit
PB: predicated region body
PF: predicated region fallthrough
CT: control target
= control target key end

     0   :  { %10 = vsyncpa [#allocation7], 0  ;;  %s942_s0 = inlined_call_operand.vmem [shape: bf16[16,16], index: 0, kind: input, shape index: {}]   ;;  %s943_s1 = inlined_call_operand.vmem [shape: bf16[16,8], index: 1, kind: input, shape index: {}]   ;;  %s944_s2 = inlined_call_operand.vmem [shape: bf16[8,128], index: 2, kind: input, shape index: {}]   ;;  %s945_s3 = inlined_call_operand.hbm [shape: bf16[3,128,128], index: 3, kind: input, shape index: {}]   ;;  %s946_s4 = inlined_call_operand.hbm [shape: f32[10,128], index: 4, kind: input, shape index: {}]   ;;  %s947_s5 = inlined_call_operand.hbm [shape: f32[16,128], index: 5, kind: output, shape index: {}]  }
   0x1   :  { %11 = vsyncpa [#allocation10], 0 }
   0x2   :  { %12 = vsyncpa [#allocation8], 0  ;;  %s21_s20 = sshll.u32 %s945_s3, 4  ;;  %s878_s21 = smov [#allocation6]   ;;  %s22_s20 = int_to_ptr.hbm [resolvable:$true] %s21_s20 }
   0x3   :  { %s23_s22 = sshll.u32 %s878_s21, 4  ;;  %s34_s25 = sshll.u32 %s946_s4, 4  ;;  %s24_s22 = int_to_ptr.vmem [resolvable:$true] %s23_s22  ;;  %s35_s25 = int_to_ptr.hbm [resolvable:$true] %s34_s25 }
   0x4   :  { %s879_s26 = smov 64   ;;  %s880_s27 = smov 4  }
   0x5   :  { %29 = dma.hbm_to_vmem [thread:$0]  %s22_s20, 3072, %s24_s22, [#allocation7], %s879_s26, %s879_s26, %s880_s27  }
   0x6   :  { %s881_s28 = smov [#allocation9]   ;;  %s882_s30 = smov 128  }
   0x7   :  { %s36_s29 = sshll.u32 %s881_s28, 4  ;;  %s883_s6 = smov 8   ;;  %s37_s29 = int_to_ptr.vmem [resolvable:$true] %s36_s29 }
   0x8   :  { %42 = dma.hbm_to_vmem [thread:$0]  %s35_s25, 256, %s37_s29, [#allocation10], %s882_s30, %s882_s30, %s883_s6  }
   0x9   :  { %870 = dma.done.wait [#allocation7], 3072  }
   0xa   :  { %871 = vsyncadd [#allocation7], 4294964224 }
   0xb   :  { %872 = dma.done.wait [#allocation10], 256  }
   0xc   :  { %873 = vsyncadd [#allocation10], 4294967040  ;;  %v78_v0 = vld [vmem:[%s942_s0] sm:$0xff] }
   0xd   :  { %79 = vst [vmem:[#allocation4] sm:$0xff] %v78_v0 }
   0xe   :  { %85 = vsyncadd [#allocation5], 128  ;;  %v88_v1 = vld [vmem:[%s944_s2] sm:$0xf]  ;;  %vm100_vm0 = vcmask 1043456   ;;  %vm96_vm1 = vcmask 64512  }
   0xf   :  { %v102_v2 = vsel %vm100_vm0, %v88_v1, 0  ;;  %v750_v3 = vld [vmem:[%s943_s1] sm:$0xff]  ;;  %v785_v4 = vld [vmem:[#allocation9] ss:$0 sm:$0xff] }
  0x10   :  { %111 = vmatpush.bf16.msra.mxu0 %v102_v2 }
  0x13   :  { %637 = vmatmul.msk.bf16.vlgmr.msra.gmra.mxu0 %vm96_vm1, %v750_v3 }
  0x90   :  { %v113_v5 = vpop.f32.mrf.mxu0 }
  0x91   :  { %v114_v6 = vadd.f32 %v785_v4, %v113_v5 }
  0x98   :  { %v115_v7 = vpop.f32.mrf.mxu0 }
  0x99   :  { %v116_v8 = vadd.f32 %v785_v4, %v115_v7 }
  0x9a   :  { %874 = dma.done.wait [#allocation5], 128 }
  0x9b   :  { %875 = vsyncadd [#allocation5], 4294967168  ;;  %v145_v9 = vpack.c.bf16 %v116_v8, %v114_v6  ;;  %vm153_vm2 = vcmask 130048   ;;  %v759_v10 = vld [vmem:[#allocation4] sm:$0xff]  ;;  %v757_v12 = vld [vmem:[#allocation6 + $0x30] sm:$0xff]  ;;  %s884_s0 = smov [#allocation11]  }
  0x9c   :  { %v758_v11 = vld [vmem:[#allocation6 + $0x38] sm:$0xff]  ;;  %v756_v13 = vld [vmem:[#allocation6 + $0x28] sm:$0xff]  ;;  %v755_v14 = vld [vmem:[#allocation6 + $0x20] sm:$0xff]  ;;  %s607_s1 = sshll.u32 %s884_s0, 4  ;;  %s609_s12 = sshll.u32 %s947_s5, 4  ;;  %s608_s1 = int_to_ptr.vmem [resolvable:$true] %s607_s1  ;;  %s610_s12 = int_to_ptr.hbm [resolvable:$true] %s609_s12 }
  0x9d   :  { %164 = vmatpush.bf16.msra.mxu1 %v145_v9  ;;  %221 = vmatpush.bf16.msra.mxu2 %v758_v11  ;;  %v754_v15 = vld [vmem:[#allocation6 + $0x18] sm:$0xff]  ;;  %v753_v16 = vld [vmem:[#allocation6 + $0x10] sm:$0xff]  ;;  %v752_v17 = vld [vmem:[#allocation6 + $0x8] sm:$0xff] }
  0x9e   :  { %v751_v18 = vld [vmem:[#allocation6] sm:$0xff]  ;;  %v767_v50 = vld [vmem:[#allocation6 + $0x78] sm:$0xff]  ;;  %v766_v51 = vld [vmem:[#allocation6 + $0x70] sm:$0xff] }
  0x9f   :  { %v786_v23 = vld [vmem:[#allocation9 + $0x1] ss:$0 sm:$0xff]  ;;  %380 = vmatpush.bf16.msrb.mxu0 %v767_v50  ;;  %v765_v54 = vld [vmem:[#allocation6 + $0x68] sm:$0xff]  ;;  %v141_v59 = vld [vmem:[#allocation9 + $0x2] sm:$0x1] }
  0xa0   :  { %642 = vmatmul.msk.bf16.vlgmr.msra.gmra.mxu1 %vm153_vm2, %v759_v10  ;;  %v764_v57 = vld [vmem:[#allocation6 + $0x60] sm:$0xff]  ;;  %v763_v61 = vld [vmem:[#allocation6 + $0x58] sm:$0xff]  ;;  %v762_v10 = vld [vmem:[#allocation6 + $0x50] sm:$0xff] }
  0xa1   :  { %222 = vmatpush.bf16.msra.mxu2 %v757_v12  ;;  %v787_v1 = vld [vmem:[#allocation9 + $0x3] ss:$0 sm:$0xff]  ;;  %v768_v9 = vld [vmem:[#allocation4] sm:$0xff]  ;;  %v761_v11 = vld [vmem:[#allocation6 + $0x48] sm:$0xff] }
  0xa2   :  { %v760_v12 = vld [vmem:[#allocation6 + $0x40] sm:$0xff] }
  0xa3   :  { %381 = vmatpush.bf16.msrb.mxu0 %v766_v51  ;;  %v773_v51 = vld [vmem:[#allocation6 + $0xa0] sm:$0xff] }
  0xa5   :  { %223 = vmatpush.bf16.msra.mxu2 %v756_v13 }
  0xa7   :  { %382 = vmatpush.bf16.msrb.mxu0 %v765_v54 }
  0xa9   :  { %224 = vmatpush.bf16.msra.mxu2 %v755_v14 }
  0xab   :  { %383 = vmatpush.bf16.msrb.mxu0 %v764_v57 }
  0xad   :  { %225 = vmatpush.bf16.msra.mxu2 %v754_v15 }
  0xaf   :  { %384 = vmatpush.bf16.msrb.mxu0 %v763_v61 }
  0xb1   :  { %226 = vmatpush.bf16.msra.mxu2 %v753_v16 }
  0xb3   :  { %385 = vmatpush.bf16.msrb.mxu0 %v762_v10 }
  0xb5   :  { %227 = vmatpush.bf16.msra.mxu2 %v752_v17  ;;  %v788_v17 = vld [vmem:[#allocation9 + $0x4] ss:$0 sm:$0xff] }
  0xb7   :  { %386 = vmatpush.bf16.msrb.mxu0 %v761_v11  ;;  %v790_v11 = vld [vmem:[#allocation9 + $0x7] ss:$0 sm:$0xff] }
  0xb9   :  { %228 = vmatpush.bf16.msra.mxu2 %v751_v18 }
  0xbb   :  { %387 = vmatpush.bf16.msrb.mxu0 %v760_v12 }
 0x11d   :  { %v166_v19 = vpop.f32.mrf.mxu1 }
 0x125   :  { %v168_v20 = vpop.f32.mrf.mxu1 }
 0x126   :  { %v171_v21 = vpack.c.bf16 %v168_v20, %v166_v19 }
 0x128   :  { %229 = vmatmul.bf16.vlgmr.msra.gmra.mxu2 %v171_v21 }
 0x1ab   :  { %v230_v22 = vpop.f32.mrf.mxu2 }
 0x1ac   :  { %v231_v24 = vadd.f32 %v786_v23, %v230_v22 }
 0x1ae   :  { %v235_v27 = vadd.f32 %v231_v24, %v114_v6 }
 0x1b3   :  { %v232_v25 = vpop.f32.mrf.mxu2 }
 0x1b4   :  { %v233_v26 = vadd.f32 %v786_v23, %v232_v25 }
 0x1b6   :  { %v236_v28 = vadd.f32 %v233_v26, %v116_v8 }
 0x1b8   :  { %v241_v29 = vadd.f32 %v236_v28, %v235_v27 }
 0x1ba   :  { %v242_v30 = vrot.slane %v241_v29, 4 }
 0x1bc   :  { %v243_v31 = vadd.f32 %v242_v30, %v241_v29 }
 0x1be   :  { %v244_v32 = vrot.slane %v243_v31, 2 }
 0x1c0   :  { %v245_v33 = vadd.f32 %v244_v32, %v243_v31 }
 0x1c2   :  { %v246_v34 = vrot.slane %v245_v33, 1 }
 0x1c4   :  { %v247_v35 = vadd.f32 %v246_v34, %v245_v33 }
 0x1c6   :  { %v248_v36 = vmul.f32 0.0625, %v247_v35 }
 0x1c8   :  { %v250_v37 = vsub.f32 %v236_v28, %v248_v36  ;;  %v249_v38 = vsub.f32 %v235_v27, %v248_v36 }
 0x1ca   :  { %v252_v39 = vmul.f32 %v250_v37, %v250_v37  ;;  %v251_v40 = vmul.f32 %v249_v38, %v249_v38 }
 0x1cc   :  { %v253_v41 = vadd.f32 %v252_v39, %v251_v40 }
 0x1ce   :  { %v254_v42 = vrot.slane %v253_v41, 4 }
 0x1d0   :  { %v255_v43 = vadd.f32 %v254_v42, %v253_v41 }
 0x1d2   :  { %v256_v44 = vrot.slane %v255_v43, 2 }
 0x1d4   :  { %v257_v45 = vadd.f32 %v256_v44, %v255_v43  ;;  %v776_v44 = vld [vmem:[#allocation6 + $0xb8] sm:$0xff] }
 0x1d6   :  { %v258_v46 = vrot.slane %v257_v45, 1 }
 0x1d8   :  { %v259_v47 = vadd.f32 %v258_v46, %v257_v45  ;;  %v775_v45 = vld [vmem:[#allocation6 + $0xb0] sm:$0xff] }
 0x1da   :  { %v260_v48 = vmul.f32 0.0625, %v259_v47 }
 0x1dc   :  { %v261_v49 = vadd.f32 1e-05, %v260_v48  ;;  %v774_v48 = vld [vmem:[#allocation6 + $0xa8] sm:$0xff] }
 0x1de   :  { %792 = vrsqrt.f32 %v261_v49  ;;  %vm268_vm4 = vweird.f32 %v261_v49 }
 0x1e4   :  { %v793_v52 = vpop.eup %792 }
 0x1e5   :  { %v263_v53 = vmul.f32 %v793_v52, %v261_v49  ;;  %vm269_vm3 = vweird.f32 %v793_v52 }
 0x1e6   :  { %vm270_vm5 = vmor %vm268_vm4, %vm269_vm3 }
 0x1e7   :  { %v264_v55 = vmul.f32 %v793_v52, %v263_v53  ;;  %v301_v53 = vld [vmem:[#allocation9 + $0x5] sm:$0x1] }
 0x1e9   :  { %v265_v56 = vmul.f32 0.5, %v264_v55  ;;  %v772_v55 = vld [vmem:[#allocation6 + $0x98] sm:$0xff] }
 0x1eb   :  { %v266_v58 = vsub.f32 1.5, %v265_v56 }
 0x1ed   :  { %v267_v60 = vmul.f32 %v793_v52, %v266_v58 }
 0x1ef   :  { %v271_v62 = vsel %vm270_vm5, %v793_v52, %v267_v60 }
 0x1f0   :  { %v272_v63 = vmul.f32 %v271_v62, %v141_v59  ;;  %v789_v59 = vld [vmem:[#allocation9 + $0x6] ss:$0 sm:$0xff] }
 0x1f2   :  { %v273_v0 = vperm.slane %v272_v63, 0 }
 0x1f4   :  { %v274_v2 = vmul.f32 %v273_v0, %v249_v38  ;;  %v275_v3 = vmul.f32 %v273_v0, %v250_v37 }
 0x1f6   :  { %v277_v4 = vadd.f32 %v787_v1, %v274_v2  ;;  %v278_v5 = vadd.f32 %v787_v1, %v275_v3  ;;  %v777_v3 = vld [vmem:[#allocation4] sm:$0xff] }
 0x1f8   :  { %v279_v6 = vmax.f32 %v277_v4, 0.0  ;;  %v280_v7 = vmax.f32 %v278_v5, 0.0  ;;  %v771_v4 = vld [vmem:[#allocation6 + $0x90] sm:$0xff]  ;;  %v770_v5 = vld [vmem:[#allocation6 + $0x88] sm:$0xff] }
 0x1fa   :  { %v305_v8 = vpack.c.bf16 %v280_v7, %v279_v6 }
 0x1fc   :  { %323 = vmatpush.bf16.msra.mxu3 %v305_v8 }
 0x1ff   :  { %679 = vmatmul.msk.bf16.vlgmr.msra.gmra.mxu3 %vm153_vm2, %v768_v9 }
 0x200   :  { %539 = vmatpush.bf16.msrb.mxu3 %v776_v44 }
 0x204   :  { %540 = vmatpush.bf16.msrb.mxu3 %v775_v45 }
 0x208   :  { %541 = vmatpush.bf16.msrb.mxu3 %v774_v48  ;;  %v791_v48 = vld [vmem:[#allocation9 + $0x9] ss:$0 sm:$0xff] }
 0x20c   :  { %542 = vmatpush.bf16.msrb.mxu3 %v773_v51 }
 0x210   :  { %543 = vmatpush.bf16.msrb.mxu3 %v772_v55 }
 0x214   :  { %544 = vmatpush.bf16.msrb.mxu3 %v771_v4 }
 0x218   :  { %545 = vmatpush.bf16.msrb.mxu3 %v770_v5 }
 0x282   :  { %v325_v13 = vpop.f32.mrf.mxu3 }
 0x28a   :  { %v327_v14 = vpop.f32.mrf.mxu3 }
 0x28b   :  { %v330_v15 = vpack.c.bf16 %v327_v14, %v325_v13 }
 0x28d   :  { %388 = vmatmul.bf16.vlgmr.msrb.gmra.mxu0 %v330_v15 }
 0x30a   :  { %v389_v16 = vpop.f32.mrf.mxu0 }
 0x30b   :  { %v390_v18 = vadd.f32 %v788_v17, %v389_v16 }
 0x30d   :  { %v394_v21 = vadd.f32 %v390_v18, %v279_v6  ;;  %v769_v6 = vld [vmem:[#allocation6 + $0x80] sm:$0xff] }
 0x30e   :  { %546 = vmatpush.bf16.msrb.mxu3 %v769_v6 }
 0x312   :  { %v391_v19 = vpop.f32.mrf.mxu0 }
 0x313   :  { %v392_v20 = vadd.f32 %v788_v17, %v391_v19 }
 0x315   :  { %v395_v22 = vadd.f32 %v392_v20, %v280_v7 }
 0x317   :  { %v400_v23 = vadd.f32 %v395_v22, %v394_v21 }
 0x319   :  { %v401_v24 = vrot.slane %v400_v23, 4 }
 0x31b   :  { %v402_v25 = vadd.f32 %v401_v24, %v400_v23 }
 0x31d   :  { %v403_v26 = vrot.slane %v402_v25, 2 }
 0x31f   :  { %v404_v27 = vadd.f32 %v403_v26, %v402_v25 }
 0x321   :  { %v405_v28 = vrot.slane %v404_v27, 1 }
 0x323   :  { %v406_v29 = vadd.f32 %v405_v28, %v404_v27 }
 0x325   :  { %v407_v30 = vmul.f32 0.0625, %v406_v29 }
 0x327   :  { %v409_v31 = vsub.f32 %v395_v22, %v407_v30  ;;  %v408_v32 = vsub.f32 %v394_v21, %v407_v30 }
 0x329   :  { %v411_v33 = vmul.f32 %v409_v31, %v409_v31  ;;  %v410_v34 = vmul.f32 %v408_v32, %v408_v32 }
 0x32b   :  { %v412_v35 = vadd.f32 %v411_v33, %v410_v34 }
 0x32d   :  { %v413_v36 = vrot.slane %v412_v35, 4 }
 0x32f   :  { %v414_v37 = vadd.f32 %v413_v36, %v412_v35 }
 0x331   :  { %v415_v38 = vrot.slane %v414_v37, 2 }
 0x333   :  { %v416_v39 = vadd.f32 %v415_v38, %v414_v37 }
 0x335   :  { %v417_v40 = vrot.slane %v416_v39, 1 }
 0x337   :  { %v418_v41 = vadd.f32 %v417_v40, %v416_v39 }
 0x339   :  { %v419_v42 = vmul.f32 0.0625, %v418_v41 }
 0x33b   :  { %v420_v43 = vadd.f32 1e-05, %v419_v42 }
 0x33d   :  { %794 = vrsqrt.f32 %v420_v43  ;;  %vm427_vm7 = vweird.f32 %v420_v43 }
 0x343   :  { %v795_v46 = vpop.eup %794 }
 0x344   :  { %v422_v47 = vmul.f32 %v795_v46, %v420_v43  ;;  %vm428_vm6 = vweird.f32 %v795_v46  ;;  %v460_v43 = vld [vmem:[#allocation9 + $0x8] sm:$0x1] }
 0x345   :  { %vm429_vm8 = vmor %vm427_vm7, %vm428_vm6 }
 0x346   :  { %v423_v49 = vmul.f32 %v795_v46, %v422_v47 }
 0x348   :  { %v424_v50 = vmul.f32 0.5, %v423_v49 }
 0x34a   :  { %v425_v52 = vsub.f32 1.5, %v424_v50 }
 0x34c   :  { %v426_v54 = vmul.f32 %v795_v46, %v425_v52 }
 0x34e   :  { %v430_v56 = vsel %vm429_vm8, %v795_v46, %v426_v54 }
 0x34f   :  { %v431_v57 = vmul.f32 %v430_v56, %v301_v53 }
 0x351   :  { %v432_v58 = vperm.slane %v431_v57, 0 }
 0x353   :  { %v433_v60 = vmul.f32 %v432_v58, %v408_v32  ;;  %v434_v61 = vmul.f32 %v432_v58, %v409_v31 }
 0x355   :  { %v436_v62 = vadd.f32 %v789_v59, %v433_v60  ;;  %v437_v63 = vadd.f32 %v789_v59, %v434_v61 }
 0x357   :  { %v438_v0 = vmax.f32 %v436_v62, 0.0  ;;  %v439_v1 = vmax.f32 %v437_v63, 0.0 }
 0x359   :  { %v464_v2 = vpack.c.bf16 %v439_v1, %v438_v0 }
 0x35b   :  { %482 = vmatpush.bf16.msrb.mxu1 %v464_v2 }
 0x35e   :  { %716 = vmatmul.msk.bf16.vlgmr.msrb.gmra.mxu1 %vm153_vm2, %v777_v3 }
 0x3db   :  { %v484_v7 = vpop.f32.mrf.mxu1 }
 0x3e3   :  { %v486_v8 = vpop.f32.mrf.mxu1 }
 0x3e4   :  { %v489_v9 = vpack.c.bf16 %v486_v8, %v484_v7 }
 0x3e6   :  { %547 = vmatmul.bf16.vlgmr.msrb.gmra.mxu3 %v489_v9 }
 0x469   :  { %v548_v10 = vpop.f32.mrf.mxu3 }
 0x46a   :  { %v549_v12 = vadd.f32 %v790_v11, %v548_v10 }
 0x46c   :  { %v553_v15 = vadd.f32 %v549_v12, %v438_v0 }
 0x471   :  { %v550_v13 = vpop.f32.mrf.mxu3 }
 0x472   :  { %v551_v14 = vadd.f32 %v790_v11, %v550_v13 }
 0x474   :  { %v554_v16 = vadd.f32 %v551_v14, %v439_v1 }
 0x476   :  { %v559_v17 = vadd.f32 %v554_v16, %v553_v15 }
 0x478   :  { %v560_v18 = vrot.slane %v559_v17, 4 }
 0x47a   :  { %v561_v19 = vadd.f32 %v560_v18, %v559_v17 }
 0x47c   :  { %v562_v20 = vrot.slane %v561_v19, 2 }
 0x47e   :  { %v563_v21 = vadd.f32 %v562_v20, %v561_v19 }
 0x480   :  { %v564_v22 = vrot.slane %v563_v21, 1 }
 0x482   :  { %v565_v23 = vadd.f32 %v564_v22, %v563_v21 }
 0x484   :  { %v566_v24 = vmul.f32 0.0625, %v565_v23 }
 0x486   :  { %v567_v25 = vsub.f32 %v553_v15, %v566_v24  ;;  %v568_v26 = vsub.f32 %v554_v16, %v566_v24 }
 0x488   :  { %v569_v27 = vmul.f32 %v567_v25, %v567_v25  ;;  %v570_v28 = vmul.f32 %v568_v26, %v568_v26 }
 0x48a   :  { %v571_v29 = vadd.f32 %v570_v28, %v569_v27 }
 0x48c   :  { %v572_v30 = vrot.slane %v571_v29, 4 }
 0x48e   :  { %v573_v31 = vadd.f32 %v572_v30, %v571_v29 }
 0x490   :  { %v574_v32 = vrot.slane %v573_v31, 2 }
 0x492   :  { %v575_v33 = vadd.f32 %v574_v32, %v573_v31 }
 0x494   :  { %v576_v34 = vrot.slane %v575_v33, 1 }
 0x496   :  { %v577_v35 = vadd.f32 %v576_v34, %v575_v33 }
 0x498   :  { %v578_v36 = vmul.f32 0.0625, %v577_v35 }
 0x49a   :  { %v579_v37 = vadd.f32 1e-05, %v578_v36 }
 0x49c   :  { %796 = vrsqrt.f32 %v579_v37  ;;  %vm586_vm10 = vweird.f32 %v579_v37 }
 0x4a2   :  { %v797_v38 = vpop.eup %796 }
 0x4a3   :  { %v581_v39 = vmul.f32 %v797_v38, %v579_v37  ;;  %vm587_vm9 = vweird.f32 %v797_v38 }
 0x4a4   :  { %vm588_vm11 = vmor %vm586_vm10, %vm587_vm9 }
 0x4a5   :  { %v582_v40 = vmul.f32 %v797_v38, %v581_v39 }
 0x4a7   :  { %v583_v41 = vmul.f32 0.5, %v582_v40 }
 0x4a9   :  { %v584_v42 = vsub.f32 1.5, %v583_v41 }
 0x4ab   :  { %v585_v44 = vmul.f32 %v797_v38, %v584_v42 }
 0x4ad   :  { %v589_v45 = vsel %vm588_vm11, %v797_v38, %v585_v44 }
 0x4ae   :  { %v590_v46 = vmul.f32 %v589_v45, %v460_v43 }
 0x4b0   :  { %v591_v47 = vperm.slane %v590_v46, 0 }
 0x4b2   :  { %v593_v49 = vmul.f32 %v591_v47, %v568_v26  ;;  %v592_v50 = vmul.f32 %v591_v47, %v567_v25 }
 0x4b4   :  { %v595_v51 = vadd.f32 %v791_v48, %v592_v50  ;;  %v596_v52 = vadd.f32 %v791_v48, %v593_v49 }
 0x4b6   :  { %601 = vst [vmem:[#allocation11] sm:$0xff] %v595_v51 }
 0x4b7   :  { %602 = vst [vmem:[#allocation11 + $0x8] sm:$0xff] %v596_v52 }
 0x4b8   :  { %615 = dma.vmem_to_hbm [thread:$0]  %s608_s1, 256, %s610_s12, [#allocation8], %s882_s30, %s882_s30, %s883_s6  }
 0x4b9   :  { %876 = dma.done.wait [#allocation8], 256  }
 0x4ba   :  { %877 = vsyncadd [#allocation8], 4294967040 }
 0x4bb   :  { %620 = vsyncpa [#allocation7], 1 }
 0x4bc   :  { %621 = vsyncpa [#allocation10], 1 }
 0x4bd   :  { %622 = vsyncpa [#allocation8], 1 }
 0x4be   :  { %623 = vsyncmov [#allocation5] }
 0x4c1   :  { %s624_s13 = vpop.sfrf %623 }
 0x4c2   :  { %p749_p0 = scmp.ne.s32.totalorder %s624_s13, 0 }
 0x4c4   :  { %628 = shalt.err (%p749_p0)  }

</bundles_post_ra>
